<compile_context>
chip_gen: v6e
topology: v6e:2x2x1
jax: 0.10.0
libtpu: 0.0.40
codegen_flags: <defaults>
</compile_context>

<pallas_src>
import functools

import jax
import jax.numpy as jnp
from jax.experimental import pallas as pl
from jax.experimental.pallas import tpu as pltpu


# ---------------------------------------------------------------------------
# Kernel
# ---------------------------------------------------------------------------
def _icamlp_kernel(img_ref, code_ref, w1_ref, w23_ref, bias_ref, out_ref,
                   *, nd, p):
    """Fused ICAMLP forward on one batch tile.

    img_ref  : (TB, nd)           f32   nd = n_nodules * nod_dim ("b (n d)" layout)
    code_ref : (TB, code_dim)     f32
    w1_ref   : (nd + code_dim, p) bf16  rows [0:nd] -> folded img-branch weight A
                                        rows [nd: ] -> folded code-branch weight C
    w23_ref  : (2*p, p)           bf16  rows [0:p] -> W2 (zero-padded), rows [p:] -> W3
    bias_ref : (1, 3*p)           f32   [b1' | b2 | b3] each on a full 128-lane tile
    out_ref  : (TB, p)            bf16  lane-dense padded logits
    """
    img = img_ref[...].astype(jnp.bfloat16)
    code = code_ref[...].astype(jnp.bfloat16)

    # Static, tile-aligned unpack of the packed blobs (zero-cost views).
    a_w = w1_ref[:nd, :]                    # (nd, p)
    c_w = w1_ref[nd:, :]                    # (code_dim, p)
    w2 = w23_ref[:p, :]                     # (p, p)
    w3 = w23_ref[p:, :]                     # (p, p)
    b1 = bias_ref[:, :p]                    # (1, p)
    b2 = bias_ref[:, p:2 * p]               # (1, p)
    b3 = bias_ref[:, 2 * p:]                # (1, p)

    # Layer 1 (embedding linears folded in):  h1 = relu(img @ A + code @ C + b1')
    h1 = (jnp.dot(img, a_w, preferred_element_type=jnp.float32)
          + jnp.dot(code, c_w, preferred_element_type=jnp.float32)
          + b1)
    h1 = jnp.maximum(h1, 0.0).astype(jnp.bfloat16)

    # Layer 2
    h2 = jnp.dot(h1, w2, preferred_element_type=jnp.float32) + b2
    h2 = jnp.maximum(h2, 0.0).astype(jnp.bfloat16)

    # Layer 3 (lane-padded classifier)
    out = jnp.dot(h2, w3, preferred_element_type=jnp.float32) + b3
    out_ref[...] = out.astype(out_ref.dtype)


# ---------------------------------------------------------------------------
# Parameter preparation (done once; pure JAX, constant-foldable under jit)
# ---------------------------------------------------------------------------
def prepare_params(params, *, n_nodules, nod_dim):
    (w_img, b_img, w_code, b_code,
     w1_img, w1_code, b1, w2, b2, w3, b3) = params

    dim = w2.shape[0]
    num_classes = w3.shape[1]
    code_dim = w_code.shape[0]
    nd = n_nodules * nod_dim
    # Single lane-dense width P for hidden layers AND classifier output.
    p = -(-max(dim, num_classes, 128) // 128) * 128

    # bf16 sublane packing: row slices of the packed w1 blob must be 16-aligned.
    assert nd % 16 == 0, "n_nodules * nod_dim must be a multiple of 16"

    # MultiNoduleEmbedding as one 2-D matmul on the "b (n d)" input: stack the
    # shared per-nodule weight N times along rows with the 1/N mean folded in.
    w_img_stacked = jnp.tile(w_img, (n_nodules, 1)) / n_nodules        # (nd, F)

    # Fold both embedding linears into the (pre-ReLU) first MLP layer.
    a = w_img_stacked @ w1_img                                         # (nd, dim)
    c = w_code @ w1_code                                               # (Dc, dim)
    b1p = b_img @ w1_img + b_code @ w1_code + b1                       # (1, dim)

    def pad2(x, rows, cols):
        return jnp.zeros((rows, cols), jnp.float32).at[:x.shape[0], :x.shape[1]].set(x)

    # Lane-dense (128-padded) blobs.  Zero-padded lanes stay zero through
    # relu/bias, so numerics are unchanged.
    a_pad = pad2(a, nd, p)
    c_pad = pad2(c, code_dim, p)
    w2_pad = pad2(w2, p, p)
    w3_pad = pad2(w3, p, p)
    b1_pad = pad2(b1p, 1, p)
    b2_pad = pad2(b2, 1, p)
    b3_pad = pad2(b3, 1, p)

    w1_packed = jnp.concatenate([a_pad, c_pad], axis=0).astype(jnp.bfloat16)   # (nd+Dc, p)
    w23_packed = jnp.concatenate([w2_pad, w3_pad], axis=0).astype(jnp.bfloat16)  # (2p, p)
    biases = jnp.concatenate([b1_pad, b2_pad, b3_pad], axis=1)                 # (1, 3p) f32

    return dict(w1=w1_packed, w23=w23_packed, biases=biases,
                nd=nd, code_dim=code_dim, p=p, num_classes=num_classes)


# ---------------------------------------------------------------------------
# Wrapper
# ---------------------------------------------------------------------------
# Default batch tile: multiple of 256 (v6e MXU), ~2K rows so double-buffered
# activation tiles (~1 MiB each at these widths) fit v5e's 16 MiB scoped VMEM
# and v7x's 32 MiB scoped / 64 MiB physical VMEM with plenty of headroom.
_MAX_BLOCK_B = 2048


def icamlp_forward(img_flat, code, prepared, *, block_b=None):
    """img_flat: (B, n_nodules*nod_dim) "b (n d)" layout; code: (B, code_dim).

    Returns lane-padded bf16 logits of shape (B, p); valid classes are
    [:, :prepared["num_classes"]] (the consumer indexes the padded slab so the
    forward itself does not add an extra HBM slicing pass).
    """
    B = img_flat.shape[0]
    nd, code_dim, p = prepared["nd"], prepared["code_dim"], prepared["p"]
    assert img_flat.shape[1] == nd
    assert code.shape[1] == code_dim

    if block_b is None:
        block_b = min(_MAX_BLOCK_B, -(-B // 16) * 16)
    # Pad B to a multiple of the batch tile (no-op when already a multiple).
    bp = pl.cdiv(B, block_b) * block_b
    if bp != B:
        img_flat = jnp.pad(img_flat, ((0, bp - B), (0, 0)))
        code = jnp.pad(code, ((0, bp - B), (0, 0)))

    kernel = functools.partial(_icamlp_kernel, nd=nd, p=p)
    grid = (bp // block_b,)

    flops = 2 * bp * p * (nd + code_dim + p + p)
    bytes_accessed = (bp * (nd + code_dim) * 4          # f32 activations in
                      + bp * p * 2                      # bf16 padded logits out
                      + (nd + code_dim) * p * 2         # w1 blob
                      + 2 * p * p * 2                   # w23 blob
                      + 3 * p * 4)                      # biases

    out = pl.pallas_call(
        kernel,
        out_shape=jax.ShapeDtypeStruct((bp, p), jnp.bfloat16),
        grid=grid,
        in_specs=[
            pl.BlockSpec((block_b, nd), lambda i: (i, 0)),        # img tile
            pl.BlockSpec((block_b, code_dim), lambda i: (i, 0)),  # code tile
            pl.BlockSpec((nd + code_dim, p), lambda i: (0, 0)),   # w1 (resident)
            pl.BlockSpec((2 * p, p), lambda i: (0, 0)),           # w23 (resident)
            pl.BlockSpec((1, 3 * p), lambda i: (0, 0)),           # biases (resident)
        ],
        out_specs=pl.BlockSpec((block_b, p), lambda i: (i, 0)),
        compiler_params=pltpu.CompilerParams(
            dimension_semantics=("parallel",)),
        cost_estimate=pl.CostEstimate(flops=flops, transcendentals=0,
                                      bytes_accessed=bytes_accessed),
    )(img_flat, code, prepared["w1"], prepared["w23"], prepared["biases"])

    return out[:B] if bp != B else out


# ---------------------------------------------------------------------------
# Synthetic parameters (original module layout; weights stored (in, out))
# ---------------------------------------------------------------------------
def init_params(key, nod_dim, code_dim, feat_dim, num_classes):
    dim = feat_dim * 2
    ks = jax.random.split(key, 11)

    def w(k, shape):
        fan_in = shape[0]
        return jax.random.normal(k, shape, jnp.float32) / jnp.sqrt(fan_in)

    def b(k, n):
        return jax.random.normal(k, (1, n), jnp.float32) * 0.01

    w_img = w(ks[0], (nod_dim, feat_dim))
    b_img = b(ks[1], feat_dim)
    w_code = w(ks[2], (code_dim, feat_dim))
    b_code = b(ks[3], feat_dim)
    w1_full = w(ks[4], (dim, dim))
    w1_img, w1_code = w1_full[:feat_dim], w1_full[feat_dim:]
    b1 = b(ks[5], dim)
    w2 = w(ks[6], (dim, dim))
    b2 = b(ks[7], dim)
    w3 = w(ks[8], (dim, num_classes))
    b3 = b(ks[9], num_classes)
    return (w_img, b_img, w_code, b_code, w1_img, w1_code, b1, w2, b2, w3, b3)


# ---------------------------------------------------------------------------
# References
# ---------------------------------------------------------------------------
def _reference_original(img_flat, code, params, *, n_nodules, nod_dim):
    """Pure-JAX f32 reference of the original (unfused) module semantics."""
    (w_img, b_img, w_code, b_code, w1_img, w1_code, b1, w2, b2, w3, b3) = params
    B = img_flat.shape[0]
    img = img_flat.reshape(B, n_nodules, nod_dim)
    x_img = jnp.mean(img @ w_img, axis=1) + b_img
    x_code = code @ w_code + b_code
    x = jnp.concatenate([x_img, x_code], axis=1)
    w1 = jnp.concatenate([w1_img, w1_code], axis=0)
    h1 = jax.nn.relu(x @ w1 + b1)
    h2 = jax.nn.relu(h1 @ w2 + b2)
    return h2 @ w3 + b3


def _reference_prepared(img_flat, code, prepared):
    """Plain-JAX mirror of the exact kernel numerics (bf16 storage, f32 accum)."""
    nd, p = prepared["nd"], prepared["p"]
    w1, w23, biases = prepared["w1"], prepared["w23"], prepared["biases"]
    img = img_flat.astype(jnp.bfloat16)
    cde = code.astype(jnp.bfloat16)
    a_w, c_w = w1[:nd], w1[nd:]
    w2, w3 = w23[:p], w23[p:]
    b1, b2, b3 = biases[:, :p], biases[:, p:2 * p], biases[:, 2 * p:]
    h1 = (jnp.dot(img, a_w, preferred_element_type=jnp.float32)
          + jnp.dot(cde, c_w, preferred_element_type=jnp.float32) + b1)
    h1 = jnp.maximum(h1, 0.0).astype(jnp.bfloat16)
    h2 = jnp.dot(h1, w2, preferred_element_type=jnp.float32) + b2
    h2 = jnp.maximum(h2, 0.0).astype(jnp.bfloat16)
    out = (jnp.dot(h2, w3, preferred_element_type=jnp.float32) + b3).astype(jnp.bfloat16)
    return out[:, :prepared["num_classes"]]


if __name__ == "__main__":
    B = 512          # batch (2 grid steps at block_b=256, exercises the pipeline)
    N_NODULES = 4    # nodules per sample
    NOD_DIM = 16     # per-nodule feature dim
    CODE_DIM = 24    # ICA code dim
    FEAT_DIM = 32    # embedding dim per branch -> MLP dim = 64
    NUM_CLASSES = 4

    key = jax.random.PRNGKey(0)
    k_img, k_code, k_par = jax.random.split(key, 3)

    img_flat = jax.random.normal(k_img, (B, N_NODULES * NOD_DIM), jnp.float32)
    code = jax.random.normal(k_code, (B, CODE_DIM), jnp.float32)
    params = init_params(k_par, NOD_DIM, CODE_DIM, FEAT_DIM, NUM_CLASSES)
    prepared = prepare_params(params, n_nodules=N_NODULES, nod_dim=NOD_DIM)

    padded_logits = icamlp_forward(img_flat, code, prepared, block_b=256)
    padded_logits = jax.block_until_ready(padded_logits)
    assert padded_logits.shape == (B, prepared["p"])

    out = padded_logits[:, :NUM_CLASSES].astype(jnp.float32)
    assert out.shape == (B, NUM_CLASSES)

    # Tight check: kernel vs. plain-JAX mirror of the same folded/bf16 numerics.
    ref_exact = _reference_prepared(img_flat, code, prepared).astype(jnp.float32)
    assert jnp.allclose(out, ref_exact, atol=2e-2, rtol=2e-2), \
        "kernel mismatch vs packed reference"

    # Loose check: folding + bf16 storage preserves the original f32 semantics.
    ref_f32 = _reference_original(img_flat, code, params,
                                  n_nodules=N_NODULES, nod_dim=NOD_DIM)
    assert jnp.allclose(out, ref_f32, atol=1e-1, rtol=1e-1), \
        "semantics drifted vs original f32 reference"

    print("KERNEL_OK")
</pallas_src>

<mosaic_0001>
module attributes {stable_mosaic.version = 11 : i64} {
  func.func @_icamlp_kernel(%arg0: i32, %arg1: memref<256x64xf32, #tpu.memory_space<vmem>>, %arg2: memref<256x24xf32, #tpu.memory_space<vmem>>, %arg3: memref<88x128xbf16, #tpu.memory_space<vmem>>, %arg4: memref<256x128xbf16, #tpu.memory_space<vmem>>, %arg5: memref<1x384xf32, #tpu.memory_space<vmem>>, %arg6: memref<256x128xbf16, #tpu.memory_space<vmem>>) attributes {dimension_semantics = [#tpu.dimension_semantics<parallel>], iteration_bounds = array<i64: 2>, scalar_prefetch = 0 : i64, scratch_operands = 0 : i64, tpu.core_type = #tpu.core_type<tc>, window_params = [{transform_indices = @transform_0, window_bounds = array<i64: 256, 64>}, {transform_indices = @transform_1, window_bounds = array<i64: 256, 24>}, {pipeline_mode = #tpu.pipeline_mode<synchronous>, transform_indices = @transform_2, window_bounds = array<i64: 88, 128>}, {pipeline_mode = #tpu.pipeline_mode<synchronous>, transform_indices = @transform_3, window_bounds = array<i64: 256, 128>}, {pipeline_mode = #tpu.pipeline_mode<synchronous>, transform_indices = @transform_4, window_bounds = array<i64: 1, 384>}, {transform_indices = @transform_5, window_bounds = array<i64: 256, 128>}]} {
    %c0 = arith.constant 0 : index
    %c0_0 = arith.constant 0 : index
    %0 = vector.load %arg1[%c0, %c0_0] : memref<256x64xf32, #tpu.memory_space<vmem>>, vector<256x64xf32>
    %1 = arith.truncf %0 : vector<256x64xf32> to vector<256x64xbf16>
    %c0_1 = arith.constant 0 : index
    %c0_2 = arith.constant 0 : index
    %2 = vector.load %arg2[%c0_1, %c0_2] : memref<256x24xf32, #tpu.memory_space<vmem>>, vector<256x24xf32>
    %3 = arith.truncf %2 : vector<256x24xf32> to vector<256x24xbf16>
    %c0_3 = arith.constant 0 : index
    %c0_4 = arith.constant 0 : index
    %4 = vector.load %arg3[%c0_3, %c0_4] : memref<88x128xbf16, #tpu.memory_space<vmem>>, vector<64x128xbf16>
    %c64 = arith.constant 64 : index
    %c0_5 = arith.constant 0 : index
    %5 = vector.load %arg3[%c64, %c0_5] : memref<88x128xbf16, #tpu.memory_space<vmem>>, vector<24x128xbf16>
    %c0_6 = arith.constant 0 : index
    %c0_7 = arith.constant 0 : index
    %6 = vector.load %arg4[%c0_6, %c0_7] : memref<256x128xbf16, #tpu.memory_space<vmem>>, vector<128x128xbf16>
    %c128 = arith.constant 128 : index
    %c0_8 = arith.constant 0 : index
    %7 = vector.load %arg4[%c128, %c0_8] : memref<256x128xbf16, #tpu.memory_space<vmem>>, vector<128x128xbf16>
    %c0_9 = arith.constant 0 : index
    %c0_10 = arith.constant 0 : index
    %8 = vector.load %arg5[%c0_9, %c0_10] : memref<1x384xf32, #tpu.memory_space<vmem>>, vector<1x128xf32>
    %c0_11 = arith.constant 0 : index
    %c128_12 = arith.constant 128 : index
    %9 = vector.load %arg5[%c0_11, %c128_12] : memref<1x384xf32, #tpu.memory_space<vmem>>, vector<1x128xf32>
    %c0_13 = arith.constant 0 : index
    %c256 = arith.constant 256 : index
    %10 = vector.load %arg5[%c0_13, %c256] : memref<1x384xf32, #tpu.memory_space<vmem>>, vector<1x128xf32>
    %cst = arith.constant dense<0.000000e+00> : vector<256x128xf32>
    %11 = tpu.matmul %1, %4, %cst {dimension_numbers = #tpu.dot_dimension_numbers<[1], [0], [0], [1], [0, 0, 1, 1], [], []>} : vector<256x64xbf16>, vector<64x128xbf16>, vector<256x128xf32> -> vector<256x128xf32>
    %cst_14 = arith.constant dense<0.000000e+00> : vector<256x128xf32>
    %12 = tpu.matmul %3, %5, %cst_14 {dimension_numbers = #tpu.dot_dimension_numbers<[1], [0], [0], [1], [0, 0, 1, 1], [], []>} : vector<256x24xbf16>, vector<24x128xbf16>, vector<256x128xf32> -> vector<256x128xf32>
    %13 = arith.addf %11, %12 : vector<256x128xf32>
    %14 = vector.broadcast %8 : vector<1x128xf32> to vector<256x128xf32>
    %15 = arith.addf %13, %14 : vector<256x128xf32>
    %cst_15 = arith.constant 0.000000e+00 : f32
    %16 = vector.broadcast %cst_15 : f32 to vector<256x128xf32>
    %17 = arith.maximumf %15, %16 : vector<256x128xf32>
    %18 = arith.truncf %17 : vector<256x128xf32> to vector<256x128xbf16>
    %cst_16 = arith.constant dense<0.000000e+00> : vector<256x128xf32>
    %19 = tpu.matmul %18, %6, %cst_16 {dimension_numbers = #tpu.dot_dimension_numbers<[1], [0], [0], [1], [0, 0, 1, 1], [], []>} : vector<256x128xbf16>, vector<128x128xbf16>, vector<256x128xf32> -> vector<256x128xf32>
    %20 = vector.broadcast %9 : vector<1x128xf32> to vector<256x128xf32>
    %21 = arith.addf %19, %20 : vector<256x128xf32>
    %cst_17 = arith.constant 0.000000e+00 : f32
    %22 = vector.broadcast %cst_17 : f32 to vector<256x128xf32>
    %23 = arith.maximumf %21, %22 : vector<256x128xf32>
    %24 = arith.truncf %23 : vector<256x128xf32> to vector<256x128xbf16>
    %cst_18 = arith.constant dense<0.000000e+00> : vector<256x128xf32>
    %25 = tpu.matmul %24, %7, %cst_18 {dimension_numbers = #tpu.dot_dimension_numbers<[1], [0], [0], [1], [0, 0, 1, 1], [], []>} : vector<256x128xbf16>, vector<128x128xbf16>, vector<256x128xf32> -> vector<256x128xf32>
    %26 = vector.broadcast %10 : vector<1x128xf32> to vector<256x128xf32>
    %27 = arith.addf %25, %26 : vector<256x128xf32>
    %28 = arith.truncf %27 : vector<256x128xf32> to vector<256x128xbf16>
    %c0_19 = arith.constant 0 : index
    %c0_20 = arith.constant 0 : index
    %29 = vector.load %arg6[%c0_19, %c0_20] : memref<256x128xbf16, #tpu.memory_space<vmem>>, vector<256x128xbf16>
    tpu.vector_store %arg6[%c0_19, %c0_20], %28 {strides = array<i32>} : memref<256x128xbf16, #tpu.memory_space<vmem>>, vector<256x128xbf16>,
    return
  }
  func.func @transform_0(%arg0: i32) -> (i32, i32) {
    %c0_i32 = arith.constant 0 : i32
    %c0_i32_0 = arith.constant 0 : i32
    return %arg0, %c0_i32 : i32, i32
  }
  func.func @transform_1(%arg0: i32) -> (i32, i32) {
    %c0_i32 = arith.constant 0 : i32
    %c0_i32_0 = arith.constant 0 : i32
    return %arg0, %c0_i32 : i32, i32
  }
  func.func @transform_2(%arg0: i32) -> (i32, i32) {
    %c0_i32 = arith.constant 0 : i32
    %c0_i32_0 = arith.constant 0 : i32
    %c0_i32_1 = arith.constant 0 : i32
    return %c0_i32, %c0_i32_0 : i32, i32
  }
  func.func @transform_3(%arg0: i32) -> (i32, i32) {
    %c0_i32 = arith.constant 0 : i32
    %c0_i32_0 = arith.constant 0 : i32
    %c0_i32_1 = arith.constant 0 : i32
    return %c0_i32, %c0_i32_0 : i32, i32
  }
  func.func @transform_4(%arg0: i32) -> (i32, i32) {
    %c0_i32 = arith.constant 0 : i32
    %c0_i32_0 = arith.constant 0 : i32
    %c0_i32_1 = arith.constant 0 : i32
    return %c0_i32, %c0_i32_0 : i32, i32
  }
  func.func @transform_5(%arg0: i32) -> (i32, i32) {
    %c0_i32 = arith.constant 0 : i32
    %c0_i32_0 = arith.constant 0 : i32
    return %arg0, %c0_i32 : i32, i32
  }
}

</mosaic_0001>

<bundles_post_ra>
// kernel: tpu_custom_call.1
= control target key start
LH: loop header
LB: loop body
LE: loop exit
PB: predicated region body
PF: predicated region fallthrough
CT: control target
= control target key end

     0   :  { %10 = vsyncpa [#allocation3], 0  ;;  %s2712_s0 = inlined_call_operand.vmem [shape: f32[512,64], index: 0, kind: input, shape index: {}]   ;;  %s2713_s1 = inlined_call_operand.vmem [shape: f32[512,24], index: 1, kind: input, shape index: {}]   ;;  %s2714_s2 = inlined_call_operand.vmem [shape: bf16[88,128], index: 2, kind: input, shape index: {}]   ;;  %s2715_s3 = inlined_call_operand.vmem [shape: bf16[256,128], index: 3, kind: input, shape index: {}]   ;;  %s2716_s4 = inlined_call_operand.vmem [shape: f32[1,384], index: 4, kind: input, shape index: {}]   ;;  %s2717_s5 = inlined_call_operand.hbm [shape: bf16[512,128], index: 5, kind: output, shape index: {}]  }
   0x1   :  { %12 = vsyncpa [#allocation3 + $0x1], 0  ;;  %s2308_s18 = smov 0   ;;  %s2310_s19 = smov 0  }
   0x2   :  { %s2312_s20 = smov 0   ;;  %s2314_s21 = smov 0  }
   0x3 LB: > { %s2329_s22 = sadd.s32 4294967295, %s2273_s21   ;;  %s1660_s23 = sadd.s32 4294967294, %s2273_s21   ;;  %s2273_s21 = sphi %s2314_s21, %s2723_s21   ;;  %s2269_s20 = sphi %s2312_s20, %s2722_s20   ;;  %s2265_s19 = sphi %s2310_s19, %s2721_s19   ;;  %s2261_s18 = sphi %s2308_s18, %s2720_s18  }
   0x4   : > { %s2333_s24 = sadd.s32 1, %s2273_s21   ;;  %s140_s25 = sadd.s32 1, %s2269_s20 }
   0x5   : > { %s137_s26 = ssub.s32 %s2273_s21, %s2333_s24  ;;  %p150_p0 = scmp.ne.s32.totalorder %s2269_s20, %s2265_s19 }
   0x6   : > { %p138_p1 = scmp.eq.s32.totalorder %s137_s26, 0  ;;  %p151_p2 = scmp.eq.s32.totalorder %s2329_s22, 1 }
   0x7   : > { %p156_p3 = scmp.ne.s32.totalorder %s2265_s19, %s2261_s18  ;;  %p157_p4 = scmp.eq.s32.totalorder %s1660_s23, 1 }
   0x8   : > { %s2344_s27 = scalar_select %p138_p1, %s2269_s20, %s140_s25  }
   0x9   : > { %p2346_p5 = por %p151_p2, %p150_p0  ;;  %p2350_p6 = por %p157_p4, %p156_p3 }
   0xa   : > { %p1663_p7 = scmp.ge.s32.totalorder %s2273_s21, 1  ;;  %p202_p8 = scmp.lt.s32.totalorder %s2273_s21, 3 }
   0xc   : > { %p203_p9 = pnand %p1663_p7, %p202_p8 }
   0xd   : > { %s1665_s11 = sshll.u32 (!%p203_p9), %s2329_s22, 5  ;;  %s232_s13 = sand.u32 (!%p203_p9), 1, %s2265_s19  }
   0xe   : > { %206 = sbr.rel (%p203_p9) target bundleno = 723 (0x2d3), region = 40  ;;  %p236_p10 = scmp.lt.s32.totalorder (!%p203_p9), %s1665_s11, 63 }
   0xf   : > { %s1664_s16 = sshll.u32 (!%p203_p9), %s232_s13, 7  ;;  %s2275_s8 = smov (!%p203_p9), [#allocation2]  }
  0x10   : > { %s2615_s17 = scalar_lea.vmem (!%p203_p9), [#allocation2], %s1664_s16  ;;  %s2217_s9 = sshll.u32 (!%p203_p9), %s2275_s8, 4  ;;  %s2218_s9 = int_to_ptr.vmem [resolvable:$false] %s2217_s9 }
  0x11   : > { %s1586_s25 = sshll.u32 (!%p203_p9), %s2615_s17, 4  ;;  %s2666_s25 = int_to_ptr.vmem [resolvable:$true] %s1586_s25 }
  0x12   : > { %p2220_p0 = scmp.lt.s32.totalorder (!%p203_p9), %s2666_s25, %s2218_s9 }
  0x13   : > { %v2191_v0 = vld [vmem:[%s2714_s2 + $0x18] sm:$0xff]   ;;  %vm449_vm0 = vcmask 1043456   ;;  %v2192_v1 = vld [vmem:[%s2714_s2 + $0x28] ss:$0 sps:$4 sm:$0xff]   ;;  %v2193_v2 = vld [vmem:[%s2714_s2 + $0x10] sm:$0xff]   ;;  %s2725_s11 = smov (!%p236_p10, %s1665_s11), 63 }
  0x14   : > { %2013 = vmatprep.subr.bf16.mxu1 %v2191_v0  ;;  %2149 = vmatprep.subr.msk.bf16.mxu0 %vm449_vm0, %v2192_v1  ;;  %v451_v3 = vsel %vm449_vm0, %v2192_v1, 0  ;;  %v2194_v4 = vld [vmem:[%s2714_s2 + $0x20] sm:$0xff]   ;;  %v2195_v5 = vld [vmem:[%s2714_s2 + $0x8] sm:$0xff]   ;;  %v2197_v6 = vld [vmem:[%s2715_s3 + $0x38] sm:$0xff]   ;;  %s1666_s23 = sshll.u32 %s2725_s11, 3  ;;  %vm400_vm1 = vcmask 195584  }
  0x15   : > { %2014 = vmatpush3.bf16.msra.mxu1 %v2191_v0  ;;  %1978 = vmatpush3.bf16.msra.mxu0 %v451_v3  ;;  %v2196_v7 = vld [vmem:[%s2714_s2] sm:$0xff]   ;;  %s2381_s7 = scalar_lea.vmem %s2713_s1, %s1666_s23  ;;  %s2386_s10 = scalar_lea.vmem %s2712_s0, %s1666_s23  ;;  %v2198_v11 = vld [vmem:[%s2715_s3 + $0x30] sm:$0xff]   ;;  %vm638_vm2 = vcmask 523264   ;;  %v2199_v31 = vld [vmem:[%s2715_s3 + $0x28] sm:$0xff]  }
  0x16   : > { %2015 = vmatprep.subr.bf16.mxu1 %v2193_v2  ;;  %1979 = vmatprep.subr.bf16.mxu0 %v2194_v4  ;;  %v297_v8 = vld [vmem:[%s2381_s7] sm:$0xff]  ;;  %v298_v9 = vld [vmem:[%s2381_s7 + $0x8] sm:$0xff]  ;;  %v299_v10 = vld [vmem:[%s2381_s7 + $0x10] sm:$0xff]  ;;  %s1795_s23 = sshll.u32 %s2329_s22, 11  ;;  %s2672_s22 = scalar_lea.sflag [#allocation3], %s232_s13 }
  0x17   : > { %v329_v12 = vpack.c.bf16 %v298_v9, %v297_v8  ;;  %v300_v13 = vld [vmem:[%s2381_s7 + $0x18] sm:$0xff]  ;;  %v249_v14 = vld [vmem:[%s2386_s10] sm:$0xff]  ;;  %v250_v15 = vld [vmem:[%s2386_s10 + $0x8] sm:$0xff]  ;;  %s2664_s6 = scalar_lea.hbm %s2717_s5, %s1795_s23  ;;  %s2219_s11 = scalar_lea.vmem %s2218_s9, 4096 }
  0x18   : > { %v330_v16 = vpack.c.bf16 %v300_v13, %v299_v10  ;;  %v281_v17 = vpack.c.bf16 %v250_v15, %v249_v14  ;;  %v251_v18 = vld [vmem:[%s2386_s10 + $0x10] sm:$0xff]  ;;  %v252_v19 = vld [vmem:[%s2386_s10 + $0x18] sm:$0xff]  ;;  %v301_v20 = vld [vmem:[%s2381_s7 + $0x20] sm:$0xff] }
  0x19   : > { %2016 = vmatpush3.bf16.msra.mxu1 %v2193_v2  ;;  %1980 = vmatpush3.bf16.msra.mxu0 %v2194_v4  ;;  %v302_v21 = vld [vmem:[%s2381_s7 + $0x28] sm:$0xff]  ;;  %v282_v22 = vpack.c.bf16 %v252_v19, %v251_v18  ;;  %v253_v24 = vld [vmem:[%s2386_s10 + $0x20] sm:$0xff]  ;;  %v303_v26 = vld [vmem:[%s2381_s7 + $0x30] sm:$0xff] }
  0x1a   : > { %2017 = vmatprep.subr.bf16.mxu1 %v2195_v5  ;;  %2053 = vmatprep.subr.bf16.mxu0 %v2197_v6  ;;  %v331_v23 = vpack.c.bf16 %v302_v21, %v301_v20  ;;  %v254_v25 = vld [vmem:[%s2386_s10 + $0x28] sm:$0xff]  ;;  %v304_v27 = vld [vmem:[%s2381_s7 + $0x38] sm:$0xff]  ;;  %v305_v29 = vld [vmem:[%s2381_s7 + $0x40] sm:$0xff] }
  0x1b   : > { %1981 = vmatprep.mubr.msk.bf16.mxu0 %vm400_vm1, %v329_v12  ;;  %2021 = vmatprep.mubr.msk.bf16.mxu1 %vm638_vm2, %v281_v17  ;;  %v283_v28 = vpack.c.bf16 %v254_v25, %v253_v24  ;;  %v306_v30 = vld [vmem:[%s2381_s7 + $0x48] sm:$0xff]  ;;  %v332_v32 = vpack.c.bf16 %v304_v27, %v303_v26  ;;  %v255_v33 = vld [vmem:[%s2386_s10 + $0x30] sm:$0xff]  ;;  %v256_v34 = vld [vmem:[%s2386_s10 + $0x38] sm:$0xff] }
  0x1c   : > { %1982 = vmatmul.mubr.msk.bf16.vlgmr.msra.gmra.mxu0 %vm400_vm1, %v330_v16  ;;  %v333_v35 = vpack.c.bf16 %v306_v30, %v305_v29  ;;  %v257_v36 = vld [vmem:[%s2386_s10 + $0x40] sm:$0xff]  ;;  %v258_v37 = vld [vmem:[%s2386_s10 + $0x48] sm:$0xff]  ;;  %v284_v39 = vpack.c.bf16 %v256_v34, %v255_v33  ;;  %v307_v40 = vld [vmem:[%s2381_s7 + $0x50] sm:$0xff] }
  0x1d   : > { %2018 = vmatpush3.bf16.msra.mxu1 %v2195_v5  ;;  %2054 = vmatpush3.bf16.msra.mxu0 %v2197_v6  ;;  %v2200_v38 = vld [vmem:[%s2715_s3 + $0x20] sm:$0xff]   ;;  %v308_v41 = vld [vmem:[%s2381_s7 + $0x58] sm:$0xff]  ;;  %v285_v42 = vpack.c.bf16 %v258_v37, %v257_v36  ;;  %v310_v44 = vld [vmem:[%s2381_s7 + $0x68] sm:$0xff] }
  0x1e   : > { %2019 = vmatprep.subr.bf16.mxu1 %v2196_v7  ;;  %1985 = vmatprep.mubr.msk.bf16.mxu0 %vm400_vm1, %v331_v23  ;;  %v309_v43 = vld [vmem:[%s2381_s7 + $0x60] sm:$0xff]  ;;  %v334_v45 = vpack.c.bf16 %v308_v41, %v307_v40  ;;  %v259_v46 = vld [vmem:[%s2386_s10 + $0x50] sm:$0xff]  ;;  %v260_v47 = vld [vmem:[%s2386_s10 + $0x58] sm:$0xff] }
  0x1f   : > { %2055 = vmatprep.subr.bf16.mxu0 %v2198_v11  ;;  %v335_v48 = vpack.c.bf16 %v310_v44, %v309_v43  ;;  %v261_v49 = vld [vmem:[%s2386_s10 + $0x60] sm:$0xff]  ;;  %v262_v50 = vld [vmem:[%s2386_s10 + $0x68] sm:$0xff]  ;;  %v286_v51 = vpack.c.bf16 %v260_v47, %v259_v46  ;;  %v311_v52 = vld [vmem:[%s2381_s7 + $0x70] sm:$0xff] }
  0x20   : > { %v312_v53 = vld [vmem:[%s2381_s7 + $0x78] sm:$0xff]  ;;  %v313_v54 = vld [vmem:[%s2381_s7 + $0x80] sm:$0xff]  ;;  %v287_v55 = vpack.c.bf16 %v262_v50, %v261_v49  ;;  %v314_v56 = vld [vmem:[%s2381_s7 + $0x88] sm:$0xff] }
  0x21   : > { %2020 = vmatpush3.bf16.msra.mxu1 %v2196_v7  ;;  %2056 = vmatpush3.bf16.msra.mxu0 %v2198_v11  ;;  %v2201_v57 = vld [vmem:[%s2715_s3 + $0x18] sm:$0xff]   ;;  %v2202_v58 = vld [vmem:[%s2715_s3 + $0x10] sm:$0xff]   ;;  %v336_v61 = vpack.c.bf16 %v312_v53, %v311_v52  ;;  %v265_v62 = vld [vmem:[%s2386_s10 + $0x80] sm:$0xff]  ;;  %v337_v0 = vpack.c.bf16 %v314_v56, %v313_v54 }
  0x22   : > { %2057 = vmatprep.subr.bf16.mxu0 %v2199_v31  ;;  %v263_v59 = vld [vmem:[%s2386_s10 + $0x70] sm:$0xff]  ;;  %v264_v60 = vld [vmem:[%s2386_s10 + $0x78] sm:$0xff]  ;;  %v266_v63 = vld [vmem:[%s2386_s10 + $0x88] sm:$0xff] }
  0x23   : > { %v315_v1 = vld [vmem:[%s2381_s7 + $0x90] sm:$0xff]  ;;  %v288_v2 = vpack.c.bf16 %v264_v60, %v263_v59  ;;  %v316_v3 = vld [vmem:[%s2381_s7 + $0x98] sm:$0xff]  ;;  %v289_v4 = vpack.c.bf16 %v266_v63, %v265_v62  ;;  %v317_v5 = vld [vmem:[%s2381_s7 + $0xa0] sm:$0xff] }
  0x24   : > { %2022 = vmatmul.mubr.msk.bf16.vlgmr.msra.gmra.mxu1 %vm638_vm2, %v282_v22  ;;  %1986 = vmatmul.mubr.msk.bf16.gmra.mxu0 %vm400_vm1, %v332_v32  ;;  %v318_v6 = vld [vmem:[%s2381_s7 + $0xa8] sm:$0xff]  ;;  %v338_v7 = vpack.c.bf16 %v316_v3, %v315_v1  ;;  %v267_v8 = vld [vmem:[%s2386_s10 + $0x90] sm:$0xff]  ;;  %v268_v9 = vld [vmem:[%s2386_s10 + $0x98] sm:$0xff] }
  0x25   : > { %2025 = vmatprep.mubr.msk.bf16.mxu1 %vm638_vm2, %v283_v28  ;;  %1989 = vmatprep.mubr.msk.bf16.mxu0 %vm400_vm1, %v333_v35  ;;  %v339_v10 = vpack.c.bf16 %v318_v6, %v317_v5  ;;  %v269_v11 = vld [vmem:[%s2386_s10 + $0xa0] sm:$0xff]  ;;  %v270_v12 = vld [vmem:[%s2386_s10 + $0xa8] sm:$0xff]  ;;  %v290_v13 = vpack.c.bf16 %v268_v9, %v267_v8  ;;  %v319_v14 = vld [vmem:[%s2381_s7 + $0xb0] sm:$0xff] }
  0x26   : > { %2058 = vmatpush3.bf16.msra.mxu0 %v2199_v31  ;;  %v320_v15 = vld [vmem:[%s2381_s7 + $0xb8] sm:$0xff]  ;;  %v291_v16 = vpack.c.bf16 %v270_v12, %v269_v11  ;;  %v321_v17 = vld [vmem:[%s2381_s7 + $0xc0] sm:$0xff]  ;;  %v322_v18 = vld [vmem:[%s2381_s7 + $0xc8] sm:$0xff] }
  0x27   : > { %2059 = vmatprep.subr.bf16.mxu0 %v2200_v38  ;;  %v340_v19 = vpack.c.bf16 %v320_v15, %v319_v14  ;;  %v271_v20 = vld [vmem:[%s2386_s10 + $0xb0] sm:$0xff]  ;;  %v272_v21 = vld [vmem:[%s2386_s10 + $0xb8] sm:$0xff]  ;;  %v341_v22 = vpack.c.bf16 %v322_v18, %v321_v17  ;;  %v273_v23 = vld [vmem:[%s2386_s10 + $0xc0] sm:$0xff] }
  0x28   : > { %v274_v24 = vld [vmem:[%s2386_s10 + $0xc8] sm:$0xff]  ;;  %v292_v25 = vpack.c.bf16 %v272_v21, %v271_v20  ;;  %v323_v26 = vld [vmem:[%s2381_s7 + $0xd0] sm:$0xff]  ;;  %v324_v27 = vld [vmem:[%s2381_s7 + $0xd8] sm:$0xff] }
  0x29   : > { %v293_v28 = vpack.c.bf16 %v274_v24, %v273_v23  ;;  %v325_v29 = vld [vmem:[%s2381_s7 + $0xe0] sm:$0xff]  ;;  %v326_v30 = vld [vmem:[%s2381_s7 + $0xe8] sm:$0xff]  ;;  %v342_v31 = vpack.c.bf16 %v324_v27, %v323_v26  ;;  %v275_v32 = vld [vmem:[%s2386_s10 + $0xd0] sm:$0xff] }
  0x2a   : > { %2060 = vmatpush3.bf16.msra.mxu0 %v2200_v38  ;;  %v276_v33 = vld [vmem:[%s2386_s10 + $0xd8] sm:$0xff]  ;;  %v343_v34 = vpack.c.bf16 %v326_v30, %v325_v29  ;;  %v277_v35 = vld [vmem:[%s2386_s10 + $0xe0] sm:$0xff]  ;;  %v278_v36 = vld [vmem:[%s2386_s10 + $0xe8] sm:$0xff] }
  0x2b   : > { %2061 = vmatprep.subr.bf16.mxu0 %v2201_v57  ;;  %v294_v37 = vpack.c.bf16 %v276_v33, %v275_v32  ;;  %v327_v38 = vld [vmem:[%s2381_s7 + $0xf0] sm:$0xff]  ;;  %v295_v40 = vpack.c.bf16 %v278_v36, %v277_v35  ;;  %v280_v43 = vld [vmem:[%s2386_s10 + $0xf8] sm:$0xff]  ;;  %v2204_v46 = vld [vmem:[%s2715_s3] sm:$0xff]  }
  0x2c   : > { %2026 = vmatmul.mubr.msk.bf16.gmra.mxu1 %vm638_vm2, %v284_v39  ;;  %1990 = vmatmul.mubr.msk.bf16.gmra.mxu0 %vm400_vm1, %v334_v45  ;;  %v328_v39 = vld [vmem:[%s2381_s7 + $0xf8] sm:$0xff]  ;;  %v2203_v45 = vld [vmem:[%s2715_s3 + $0x8] sm:$0xff]   ;;  %v2208_v50 = vld [vmem:[%s2715_s3 + $0x60] sm:$0xff]   ;;  %s2213_s7 = scalar_lea.vmem %s2666_s25, 2048 }
  0x2d   : > { %2029 = vmatprep.mubr.msk.bf16.mxu1 %vm638_vm2, %v285_v42  ;;  %1993 = vmatprep.mubr.msk.bf16.mxu0 %vm400_vm1, %v335_v48  ;;  %v344_v41 = vpack.c.bf16 %v328_v39, %v327_v38  ;;  %v279_v42 = vld [vmem:[%s2386_s10 + $0xf0] sm:$0xff]  ;;  %v2205_v47 = vld [vmem:[%s2715_s3 + $0x78] sm:$0xff]   ;;  %v2207_v49 = vld [vmem:[%s2715_s3 + $0x68] sm:$0xff]   ;;  %p2214_p11 = scmp.ne.s32.totalorder %s2666_s25, %s2213_s7  ;;  %p2221_p1 = scmp.lt.s32.totalorder %s2219_s11, %s2213_s7 }
  0x2e   : > { %2062 = vmatpush3.bf16.msra.mxu0 %v2201_v57  ;;  %v296_v44 = vpack.c.bf16 %v280_v43, %v279_v42  ;;  %v2206_v48 = vld [vmem:[%s2715_s3 + $0x70] sm:$0xff]   ;;  %2101 = vmatprep.subr.bf16.mxu1 %v2205_v47  ;;  %v2211_v53 = vld [vmem:[%s2715_s3 + $0x48] sm:$0xff]  }
  0x2f   : > { %2063 = vmatprep.subr.bf16.mxu0 %v2202_v58  ;;  %2102 = vmatpush3.bf16.msra.mxu1 %v2205_v47  ;;  %v2210_v52 = vld [vmem:[%s2715_s3 + $0x50] sm:$0xff]   ;;  %p2215_p12 = pnand %p2214_p11, %p2346_p5  ;;  %p2222_p2 = por %p2221_p1, %p2220_p0 }
  0x30   : > { %2103 = vmatprep.subr.bf16.mxu1 %v2206_v48 }
  0x31   : > { %p2216_p13 = pneg %p2215_p12 }
  0x32   : > { %2064 = vmatpush3.bf16.msra.mxu0 %v2202_v58 }
  0x33   : > { %2065 = vmatprep.subr.bf16.mxu0 %v2203_v45  ;;  %2104 = vmatpush3.bf16.msra.mxu1 %v2206_v48  ;;  %p2223_p3 = pnand %p2222_p2, %p2216_p13 }
  0x34   : > { %2030 = vmatmul.mubr.msk.bf16.gmra.mxu1 %vm638_vm2, %v286_v51  ;;  %1994 = vmatmul.mubr.msk.bf16.gmra.mxu0 %vm400_vm1, %v336_v61  ;;  %v2209_v51 = vld [vmem:[%s2715_s3 + $0x58] sm:$0xff]  }
  0x35   : > { %2033 = vmatprep.mubr.msk.bf16.mxu1 %vm638_vm2, %v287_v55  ;;  %1997 = vmatprep.mubr.msk.bf16.mxu0 %vm400_vm1, %v337_v0  ;;  %v2529_v0 = vld [vmem:[%s2716_s4] ss:$0 sm:$0xff] }
  0x36   : > { %2066 = vmatpush3.bf16.msra.mxu0 %v2203_v45  ;;  %2105 = vmatprep.subr.bf16.mxu1 %v2207_v49 }
  0x37   : > { %2067 = vmatprep.subr.bf16.mxu0 %v2204_v46  ;;  %2106 = vmatpush3.bf16.msra.mxu1 %v2207_v49 }
  0x38   : > { %2107 = vmatprep.subr.bf16.mxu1 %v2208_v50 }
  0x3a   : > { %2068 = vmatpush3.bf16.msra.mxu0 %v2204_v46 }
  0x3b   : > { %2108 = vmatpush3.bf16.msra.mxu1 %v2208_v50 }
  0x3c   : > { %2034 = vmatmul.mubr.msk.bf16.gmra.mxu1 %vm638_vm2, %v288_v2  ;;  %1998 = vmatmul.mubr.msk.bf16.gmra.mxu0 %vm400_vm1, %v338_v7 }
  0x3d   : > { %2037 = vmatprep.mubr.msk.bf16.mxu1 %vm638_vm2, %v289_v4  ;;  %2001 = vmatprep.mubr.msk.bf16.mxu0 %vm400_vm1, %v339_v10 }
  0x3e   : > { %2109 = vmatprep.subr.bf16.mxu1 %v2209_v51 }
  0x3f   : > { %2110 = vmatpush3.bf16.msra.mxu1 %v2209_v51 }
  0x40   : > { %2111 = vmatprep.subr.bf16.mxu1 %v2210_v52 }
  0x43   : > { %2112 = vmatpush3.bf16.msra.mxu1 %v2210_v52 }
  0x44   : > { %2038 = vmatmul.mubr.msk.bf16.gmra.mxu1 %vm638_vm2, %v290_v13  ;;  %2002 = vmatmul.mubr.msk.bf16.gmra.mxu0 %vm400_vm1, %v340_v19 }
  0x45   : > { %2041 = vmatprep.mubr.msk.bf16.mxu1 %vm638_vm2, %v291_v16  ;;  %2005 = vmatprep.mubr.msk.bf16.mxu0 %vm400_vm1, %v341_v22 }
  0x46   : > { %2113 = vmatprep.subr.bf16.mxu1 %v2211_v53 }
  0x47   : > { %2114 = vmatpush3.bf16.msra.mxu1 %v2211_v53 }
  0x4c   : > { %2042 = vmatmul.mubr.msk.bf16.gmra.mxu1 %vm638_vm2, %v292_v25  ;;  %2006 = vmatmul.mubr.msk.bf16.gmra.mxu0 %vm400_vm1, %v342_v31 }
  0x4d   : > { %2045 = vmatprep.mubr.msk.bf16.mxu1 %vm638_vm2, %v293_v28  ;;  %2009 = vmatprep.mubr.msk.bf16.mxu0 %vm400_vm1, %v343_v34 }
  0x54   : > { %2046 = vmatmul.mubr.msk.bf16.gmra.mxu1 %vm638_vm2, %v294_v37  ;;  %2010 = vmatmul.mubr.msk.bf16.gmra.mxu0 %vm400_vm1, %v344_v41 }
  0x55   : > { %2049 = vmatprep.mubr.msk.bf16.mxu1 %vm638_vm2, %v295_v40 }
  0x5c   : > { %2050 = vmatmul.mubr.msk.bf16.gmra.mxu1 %vm638_vm2, %v296_v44 }
  0xdc   : > { %v1983_v54 = vpop.f32.mrf.mxu0 }
  0xde   : > { %v487_v55 = vpop.f32.mrf.mxu0 }
  0xe0   : > { %v1984_v56 = vpop.f32.mrf.mxu0 }
  0xe2   : > { %v490_v58 = vpop.f32.mrf.mxu0 }
  0xe4   : > { %v2023_v57 = vpop.f32.mrf.mxu1  ;;  %v1987_v62 = vpop.f32.mrf.mxu0 }
  0xe5   : > { %v730_v61 = vadd.f32 %v2023_v57, %v1983_v54 }
  0xe6   : > { %v721_v59 = vpop.f32.mrf.mxu1  ;;  %v503_v2 = vpop.f32.mrf.mxu0 }
  0xe7   : > { %v722_v60 = vadd.f32 %v721_v59, %v487_v55  ;;  %v856_v7 = vadd.f32 %v2529_v0, %v730_v61 }
  0xe8   : > { %v2024_v63 = vpop.f32.mrf.mxu1  ;;  %v1988_v8 = vpop.f32.mrf.mxu0 }
  0xe9   : > { %v733_v1 = vadd.f32 %v2024_v63, %v1984_v56  ;;  %v854_v4 = vadd.f32 %v2529_v0, %v722_v60  ;;  %v888_v17 = vmax.f32 %v856_v7, 0.0 }
  0xea   : > { %v724_v3 = vpop.f32.mrf.mxu1  ;;  %v506_v12 = vpop.f32.mrf.mxu0 }
  0xeb   : > { %v857_v5 = vadd.f32 %v2529_v0, %v733_v1  ;;  %v725_v6 = vadd.f32 %v724_v3, %v490_v58  ;;  %v886_v14 = vmax.f32 %v854_v4, 0.0 }
  0xec   : > { %v2027_v9 = vpop.f32.mrf.mxu1  ;;  %v1991_v19 = vpop.f32.mrf.mxu0 }
  0xed   : > { %v855_v10 = vadd.f32 %v2529_v0, %v725_v6  ;;  %v889_v11 = vmax.f32 %v857_v5, 0.0  ;;  %v746_v18 = vadd.f32 %v2027_v9, %v1987_v62 }
  0xee   : > { %v737_v13 = vpop.f32.mrf.mxu1  ;;  %v519_v24 = vpop.f32.mrf.mxu0 }
  0xef   : > { %v887_v15 = vmax.f32 %v855_v10, 0.0  ;;  %v738_v16 = vadd.f32 %v737_v13, %v503_v2  ;;  %v919_v23 = vpack.c.bf16 %v889_v11, %v888_v17  ;;  %v860_v29 = vadd.f32 %v2529_v0, %v746_v18 }
  0xf0   : > { %v2028_v20 = vpop.f32.mrf.mxu1  ;;  %v1992_v30 = vpop.f32.mrf.mxu0 }
  0xf1   : > { %v749_v21 = vadd.f32 %v2028_v20, %v1988_v8  ;;  %v918_v22 = vpack.c.bf16 %v887_v15, %v886_v14  ;;  %v858_v26 = vadd.f32 %v2529_v0, %v738_v16  ;;  %v892_v39 = vmax.f32 %v860_v29, 0.0 }
  0xf2   : > { %v740_v25 = vpop.f32.mrf.mxu1  ;;  %v522_v34 = vpop.f32.mrf.mxu0 }
  0xf3   : > { %v861_v27 = vadd.f32 %v2529_v0, %v749_v21  ;;  %v741_v28 = vadd.f32 %v740_v25, %v506_v12  ;;  %2069 = vmatprep.mubr.bf16.mxu0 %v918_v22  ;;  %v890_v36 = vmax.f32 %v858_v26, 0.0 }
  0xf4   : > { %v2031_v31 = vpop.f32.mrf.mxu1  ;;  %2070 = vmatmul.mubr.bf16.vlgmr.msra.gmra.mxu0 %v919_v23  ;;  %v1995_v41 = vpop.f32.mrf.mxu0 }
  0xf5   : > { %v859_v32 = vadd.f32 %v2529_v0, %v741_v28  ;;  %v893_v33 = vmax.f32 %v861_v27, 0.0  ;;  %v762_v40 = vadd.f32 %v2031_v31, %v1991_v19 }
  0xf6   : > { %v753_v35 = vpop.f32.mrf.mxu1  ;;  %v535_v45 = vpop.f32.mrf.mxu0 }
  0xf7   : > { %v891_v37 = vmax.f32 %v859_v32, 0.0  ;;  %v754_v38 = vadd.f32 %v753_v35, %v519_v24  ;;  %v921_v47 = vpack.c.bf16 %v893_v33, %v892_v39  ;;  %v864_v51 = vadd.f32 %v2529_v0, %v762_v40 }
  0xf8   : > { %v2032_v42 = vpop.f32.mrf.mxu1  ;;  %v1996_v52 = vpop.f32.mrf.mxu0 }
  0xf9   : > { %v765_v43 = vadd.f32 %v2032_v42, %v1992_v30  ;;  %v920_v44 = vpack.c.bf16 %v891_v37, %v890_v36  ;;  %v862_v48 = vadd.f32 %v2529_v0, %v754_v38  ;;  %v896_v61 = vmax.f32 %v864_v51, 0.0 }
  0xfa   : > { %v756_v46 = vpop.f32.mrf.mxu1  ;;  %v538_v56 = vpop.f32.mrf.mxu0 }
  0xfb   : > { %v865_v49 = vadd.f32 %v2529_v0, %v765_v43  ;;  %v757_v50 = vadd.f32 %v756_v46, %v522_v34  ;;  %2073 = vmatprep.mubr.bf16.mxu0 %v920_v44  ;;  %v894_v58 = vmax.f32 %v862_v48, 0.0 }
  0xfc   : > { %v2035_v53 = vpop.f32.mrf.mxu1  ;;  %2074 = vmatmul.mubr.bf16.gmra.mxu0 %v921_v47  ;;  %v1999_v63 = vpop.f32.mrf.mxu0 }
  0xfd   : > { %v863_v54 = vadd.f32 %v2529_v0, %v757_v50  ;;  %v897_v55 = vmax.f32 %v865_v49, 0.0  ;;  %v778_v62 = vadd.f32 %v2035_v53, %v1995_v41 }
  0xfe   : > { %v769_v57 = vpop.f32.mrf.mxu1  ;;  %v551_v4 = vpop.f32.mrf.mxu0 }
  0xff   : > { %v895_v59 = vmax.f32 %v863_v54, 0.0  ;;  %v770_v60 = vadd.f32 %v769_v57, %v535_v45  ;;  %v923_v6 = vpack.c.bf16 %v897_v55, %v896_v61  ;;  %v868_v10 = vadd.f32 %v2529_v0, %v778_v62 }
 0x100   : > { %v2036_v1 = vpop.f32.mrf.mxu1  ;;  %v2000_v11 = vpop.f32.mrf.mxu0 }
 0x101   : > { %v781_v2 = vadd.f32 %v2036_v1, %v1996_v52  ;;  %v922_v3 = vpack.c.bf16 %v895_v59, %v894_v58  ;;  %v866_v7 = vadd.f32 %v2529_v0, %v770_v60  ;;  %v900_v20 = vmax.f32 %v868_v10, 0.0 }
 0x102   : > { %v772_v5 = vpop.f32.mrf.mxu1  ;;  %v554_v15 = vpop.f32.mrf.mxu0 }
 0x103   : > { %v869_v8 = vadd.f32 %v2529_v0, %v781_v2  ;;  %v773_v9 = vadd.f32 %v772_v5, %v538_v56  ;;  %2077 = vmatprep.mubr.bf16.mxu0 %v922_v3  ;;  %v898_v17 = vmax.f32 %v866_v7, 0.0 }
 0x104   : > { %v2039_v12 = vpop.f32.mrf.mxu1  ;;  %2078 = vmatmul.mubr.bf16.gmra.mxu0 %v923_v6  ;;  %v2003_v22 = vpop.f32.mrf.mxu0 }
 0x105   : > { %v867_v13 = vadd.f32 %v2529_v0, %v773_v9  ;;  %v901_v14 = vmax.f32 %v869_v8, 0.0  ;;  %v794_v21 = vadd.f32 %v2039_v12, %v1999_v63 }
 0x106   : > { %v785_v16 = vpop.f32.mrf.mxu1  ;;  %v567_v26 = vpop.f32.mrf.mxu0 }
 0x107   : > { %v899_v18 = vmax.f32 %v867_v13, 0.0  ;;  %v786_v19 = vadd.f32 %v785_v16, %v551_v4  ;;  %v925_v28 = vpack.c.bf16 %v901_v14, %v900_v20  ;;  %v872_v32 = vadd.f32 %v2529_v0, %v794_v21 }
 0x108   : > { %v2040_v23 = vpop.f32.mrf.mxu1  ;;  %v2004_v33 = vpop.f32.mrf.mxu0 }
 0x109   : > { %v797_v24 = vadd.f32 %v2040_v23, %v2000_v11  ;;  %v924_v25 = vpack.c.bf16 %v899_v18, %v898_v17  ;;  %v870_v29 = vadd.f32 %v2529_v0, %v786_v19  ;;  %v904_v42 = vmax.f32 %v872_v32, 0.0 }
 0x10a   : > { %v788_v27 = vpop.f32.mrf.mxu1  ;;  %v570_v37 = vpop.f32.mrf.mxu0 }
 0x10b   : > { %v873_v30 = vadd.f32 %v2529_v0, %v797_v24  ;;  %v789_v31 = vadd.f32 %v788_v27, %v554_v15  ;;  %2081 = vmatprep.mubr.bf16.mxu0 %v924_v25  ;;  %v902_v39 = vmax.f32 %v870_v29, 0.0 }
 0x10c   : > { %v2043_v34 = vpop.f32.mrf.mxu1  ;;  %2082 = vmatmul.mubr.bf16.gmra.mxu0 %v925_v28  ;;  %v2007_v44 = vpop.f32.mrf.mxu0 }
 0x10d   : > { %v871_v35 = vadd.f32 %v2529_v0, %v789_v31  ;;  %v905_v36 = vmax.f32 %v873_v30, 0.0  ;;  %v810_v43 = vadd.f32 %v2043_v34, %v2003_v22 }
 0x10e   : > { %v801_v38 = vpop.f32.mrf.mxu1  ;;  %v583_v48 = vpop.f32.mrf.mxu0 }
 0x10f   : > { %v903_v40 = vmax.f32 %v871_v35, 0.0  ;;  %v802_v41 = vadd.f32 %v801_v38, %v567_v26  ;;  %v927_v50 = vpack.c.bf16 %v905_v36, %v904_v42  ;;  %v876_v54 = vadd.f32 %v2529_v0, %v810_v43 }
 0x110   : > { %v2044_v45 = vpop.f32.mrf.mxu1  ;;  %v2008_v55 = vpop.f32.mrf.mxu0 }
 0x111   : > { %v813_v46 = vadd.f32 %v2044_v45, %v2004_v33  ;;  %v926_v47 = vpack.c.bf16 %v903_v40, %v902_v39  ;;  %v874_v51 = vadd.f32 %v2529_v0, %v802_v41  ;;  %v908_v1 = vmax.f32 %v876_v54, 0.0  ;;  %v2212_v41 = vld [vmem:[%s2715_s3 + $0x40] sm:$0xff]  }
 0x112   : > { %v804_v49 = vpop.f32.mrf.mxu1  ;;  %v586_v59 = vpop.f32.mrf.mxu0  ;;  %2115 = vmatprep.subr.bf16.mxu1 %v2212_v41 }
 0x113   : > { %v877_v52 = vadd.f32 %v2529_v0, %v813_v46  ;;  %v805_v53 = vadd.f32 %v804_v49, %v570_v37  ;;  %2085 = vmatprep.mubr.bf16.mxu0 %v926_v47  ;;  %v906_v61 = vmax.f32 %v874_v51, 0.0  ;;  %2116 = vmatpush3.bf16.msra.mxu1 %v2212_v41 }
 0x114   : > { %v2047_v56 = vpop.f32.mrf.mxu1  ;;  %2086 = vmatmul.mubr.bf16.gmra.mxu0 %v927_v50  ;;  %v2011_v3 = vpop.f32.mrf.mxu0 }
 0x115   : > { %v875_v57 = vadd.f32 %v2529_v0, %v805_v53  ;;  %v909_v58 = vmax.f32 %v877_v52, 0.0  ;;  %v826_v2 = vadd.f32 %v2047_v56, %v2007_v44 }
 0x116   : > { %v817_v60 = vpop.f32.mrf.mxu1  ;;  %v599_v7 = vpop.f32.mrf.mxu0 }
 0x117   : > { %v907_v62 = vmax.f32 %v875_v57, 0.0  ;;  %v818_v63 = vadd.f32 %v817_v60, %v583_v48  ;;  %v929_v9 = vpack.c.bf16 %v909_v58, %v908_v1  ;;  %v880_v13 = vadd.f32 %v2529_v0, %v826_v2 }
 0x118   : > { %v2048_v4 = vpop.f32.mrf.mxu1  ;;  %v2012_v17 = vpop.f32.mrf.mxu0 }
 0x119   : > { %v829_v5 = vadd.f32 %v2048_v4, %v2008_v55  ;;  %v928_v6 = vpack.c.bf16 %v907_v62, %v906_v61  ;;  %v878_v10 = vadd.f32 %v2529_v0, %v818_v63  ;;  %v912_v22 = vmax.f32 %v880_v13, 0.0 }
 0x11a   : > { %v820_v8 = vpop.f32.mrf.mxu1  ;;  %v602_v27 = vpop.f32.mrf.mxu0 }
 0x11b   : > { %v881_v11 = vadd.f32 %v2529_v0, %v829_v5  ;;  %v821_v12 = vadd.f32 %v820_v8, %v586_v59  ;;  %2089 = vmatprep.mubr.bf16.mxu0 %v928_v6  ;;  %v910_v19 = vmax.f32 %v878_v10, 0.0 }
 0x11c   : > { %v2051_v14 = vpop.f32.mrf.mxu1  ;;  %2090 = vmatmul.mubr.bf16.gmra.mxu0 %v929_v9 }
 0x11d   : > { %v879_v15 = vadd.f32 %v2529_v0, %v821_v12  ;;  %v913_v16 = vmax.f32 %v881_v11, 0.0  ;;  %v842_v23 = vadd.f32 %v2051_v14, %v2011_v3 }
 0x11e   : > { %v833_v18 = vpop.f32.mrf.mxu1 }
 0x11f   : > { %v911_v20 = vmax.f32 %v879_v15, 0.0  ;;  %v834_v21 = vadd.f32 %v833_v18, %v599_v7  ;;  %v931_v29 = vpack.c.bf16 %v913_v16, %v912_v22  ;;  %v884_v33 = vadd.f32 %v2529_v0, %v842_v23 }
 0x120   : > { %v2052_v24 = vpop.f32.mrf.mxu1 }
 0x121   : > { %v845_v25 = vadd.f32 %v2052_v24, %v2012_v17  ;;  %v930_v26 = vpack.c.bf16 %v911_v20, %v910_v19  ;;  %v882_v30 = vadd.f32 %v2529_v0, %v834_v21  ;;  %v916_v38 = vmax.f32 %v884_v33, 0.0 }
 0x122   : > { %v836_v28 = vpop.f32.mrf.mxu1 }
 0x123   : > { %v885_v31 = vadd.f32 %v2529_v0, %v845_v25  ;;  %v837_v32 = vadd.f32 %v836_v28, %v602_v27  ;;  %2093 = vmatprep.mubr.bf16.mxu0 %v930_v26  ;;  %v914_v36 = vmax.f32 %v882_v30, 0.0 }
 0x124   : > { %2094 = vmatmul.mubr.bf16.gmra.mxu0 %v931_v29 }
 0x125   : > { %v883_v34 = vadd.f32 %v2529_v0, %v837_v32  ;;  %v917_v35 = vmax.f32 %v885_v31, 0.0  ;;  %v2569_v0 = vld [vmem:[%s2716_s4 + $0x1] ss:$0 sm:$0xff] }
 0x127   : > { %v915_v37 = vmax.f32 %v883_v34, 0.0  ;;  %v933_v40 = vpack.c.bf16 %v917_v35, %v916_v38 }
 0x129   : > { %v932_v39 = vpack.c.bf16 %v915_v37, %v914_v36 }
 0x12b   : > { %2097 = vmatprep.mubr.bf16.mxu0 %v932_v39 }
 0x12c   : > { %2098 = vmatmul.mubr.bf16.gmra.mxu0 %v933_v40 }
 0x1b4   : > { %v2071_v42 = vpop.f32.mrf.mxu0 }
 0x1b5   : > { %v1031_v47 = vadd.f32 %v2071_v42, %v2569_v0 }
 0x1b6   : > { %v1022_v43 = vpop.f32.mrf.mxu0 }
 0x1b7   : > { %v1023_v45 = vadd.f32 %v2569_v0, %v1022_v43  ;;  %v1151_v54 = vmax.f32 %v1031_v47, 0.0 }
 0x1b8   : > { %v2072_v44 = vpop.f32.mrf.mxu0 }
 0x1b9   : > { %v1034_v46 = vadd.f32 %v2072_v44, %v2569_v0  ;;  %v1149_v52 = vmax.f32 %v1023_v45, 0.0 }
 0x1ba   : > { %v1025_v48 = vpop.f32.mrf.mxu0 }
 0x1bb   : > { %v1026_v49 = vadd.f32 %v2569_v0, %v1025_v48  ;;  %v1152_v50 = vmax.f32 %v1034_v46, 0.0 }
 0x1bc   : > { %v2075_v51 = vpop.f32.mrf.mxu0 }
 0x1bd   : > { %v1150_v53 = vmax.f32 %v1026_v49, 0.0  ;;  %v1182_v57 = vpack.c.bf16 %v1152_v50, %v1151_v54  ;;  %v1047_v61 = vadd.f32 %v2075_v51, %v2569_v0 }
 0x1be   : > { %v1038_v55 = vpop.f32.mrf.mxu0 }
 0x1bf   : > { %v1181_v56 = vpack.c.bf16 %v1150_v53, %v1149_v52  ;;  %v1039_v59 = vadd.f32 %v2569_v0, %v1038_v55  ;;  %v1155_v5 = vmax.f32 %v1047_v61, 0.0 }
 0x1c0   : > { %v2076_v58 = vpop.f32.mrf.mxu0 }
 0x1c1   : > { %v1050_v60 = vadd.f32 %v2076_v58, %v2569_v0  ;;  %2117 = vmatprep.mubr.bf16.mxu1 %v1181_v56  ;;  %v1153_v3 = vmax.f32 %v1039_v59, 0.0 }
 0x1c2   : > { %v1041_v62 = vpop.f32.mrf.mxu0  ;;  %2118 = vmatmul.mubr.bf16.vlgmr.msra.gmra.mxu1 %v1182_v57 }
 0x1c3   : > { %v1042_v63 = vadd.f32 %v2569_v0, %v1041_v62  ;;  %v1156_v1 = vmax.f32 %v1050_v60, 0.0 }
 0x1c4   : > { %v2079_v2 = vpop.f32.mrf.mxu0 }
 0x1c5   : > { %v1154_v4 = vmax.f32 %v1042_v63, 0.0  ;;  %v1184_v8 = vpack.c.bf16 %v1156_v1, %v1155_v5  ;;  %v1063_v12 = vadd.f32 %v2079_v2, %v2569_v0 }
 0x1c6   : > { %v1054_v6 = vpop.f32.mrf.mxu0 }
 0x1c7   : > { %v1183_v7 = vpack.c.bf16 %v1154_v4, %v1153_v3  ;;  %v1055_v10 = vadd.f32 %v2569_v0, %v1054_v6  ;;  %v1159_v19 = vmax.f32 %v1063_v12, 0.0 }
 0x1c8   : > { %v2080_v9 = vpop.f32.mrf.mxu0 }
 0x1c9   : > { %v1066_v11 = vadd.f32 %v2080_v9, %v2569_v0  ;;  %2121 = vmatprep.mubr.bf16.mxu1 %v1183_v7  ;;  %v1157_v17 = vmax.f32 %v1055_v10, 0.0 }
 0x1ca   : > { %v1057_v13 = vpop.f32.mrf.mxu0  ;;  %2122 = vmatmul.mubr.bf16.gmra.mxu1 %v1184_v8 }
 0x1cb   : > { %v1058_v14 = vadd.f32 %v2569_v0, %v1057_v13  ;;  %v1160_v15 = vmax.f32 %v1066_v11, 0.0 }
 0x1cc   : > { %v2083_v16 = vpop.f32.mrf.mxu0 }
 0x1cd   : > { %v1158_v18 = vmax.f32 %v1058_v14, 0.0  ;;  %v1186_v22 = vpack.c.bf16 %v1160_v15, %v1159_v19  ;;  %v1079_v26 = vadd.f32 %v2083_v16, %v2569_v0 }
 0x1ce   : > { %v1070_v20 = vpop.f32.mrf.mxu0 }
 0x1cf   : > { %v1185_v21 = vpack.c.bf16 %v1158_v18, %v1157_v17  ;;  %v1071_v24 = vadd.f32 %v2569_v0, %v1070_v20  ;;  %v1163_v33 = vmax.f32 %v1079_v26, 0.0 }
 0x1d0   : > { %v2084_v23 = vpop.f32.mrf.mxu0 }
 0x1d1   : > { %v1082_v25 = vadd.f32 %v2084_v23, %v2569_v0  ;;  %2125 = vmatprep.mubr.bf16.mxu1 %v1185_v21  ;;  %v1161_v31 = vmax.f32 %v1071_v24, 0.0 }
 0x1d2   : > { %v1073_v27 = vpop.f32.mrf.mxu0  ;;  %2126 = vmatmul.mubr.bf16.gmra.mxu1 %v1186_v22 }
 0x1d3   : > { %v1074_v28 = vadd.f32 %v2569_v0, %v1073_v27  ;;  %v1164_v29 = vmax.f32 %v1082_v25, 0.0 }
 0x1d4   : > { %v2087_v30 = vpop.f32.mrf.mxu0 }
 0x1d5   : > { %v1162_v32 = vmax.f32 %v1074_v28, 0.0  ;;  %v1188_v36 = vpack.c.bf16 %v1164_v29, %v1163_v33  ;;  %v1095_v40 = vadd.f32 %v2087_v30, %v2569_v0  ;;  %v2607_v29 = vld [vmem:[%s2716_s4 + $0x2] ss:$0 sm:$0xff] }
 0x1d6   : > { %v1086_v34 = vpop.f32.mrf.mxu0 }
 0x1d7   : > { %v1187_v35 = vpack.c.bf16 %v1162_v32, %v1161_v31  ;;  %v1087_v38 = vadd.f32 %v2569_v0, %v1086_v34  ;;  %v1167_v47 = vmax.f32 %v1095_v40, 0.0 }
 0x1d8   : > { %v2088_v37 = vpop.f32.mrf.mxu0 }
 0x1d9   : > { %v1098_v39 = vadd.f32 %v2088_v37, %v2569_v0  ;;  %2129 = vmatprep.mubr.bf16.mxu1 %v1187_v35  ;;  %v1165_v45 = vmax.f32 %v1087_v38, 0.0 }
 0x1da   : > { %v1089_v41 = vpop.f32.mrf.mxu0  ;;  %2130 = vmatmul.mubr.bf16.gmra.mxu1 %v1188_v36 }
 0x1db   : > { %v1090_v42 = vadd.f32 %v2569_v0, %v1089_v41  ;;  %v1168_v43 = vmax.f32 %v1098_v39, 0.0 }
 0x1dc   : > { %v2091_v44 = vpop.f32.mrf.mxu0 }
 0x1dd   : > { %v1166_v46 = vmax.f32 %v1090_v42, 0.0  ;;  %v1190_v50 = vpack.c.bf16 %v1168_v43, %v1167_v47  ;;  %v1111_v54 = vadd.f32 %v2091_v44, %v2569_v0 }
 0x1de   : > { %v1102_v48 = vpop.f32.mrf.mxu0 }
 0x1df   : > { %v1189_v49 = vpack.c.bf16 %v1166_v46, %v1165_v45  ;;  %v1103_v52 = vadd.f32 %v2569_v0, %v1102_v48  ;;  %v1171_v61 = vmax.f32 %v1111_v54, 0.0 }
 0x1e0   : > { %v2092_v51 = vpop.f32.mrf.mxu0 }
 0x1e1   : > { %v1114_v53 = vadd.f32 %v2092_v51, %v2569_v0  ;;  %2133 = vmatprep.mubr.bf16.mxu1 %v1189_v49  ;;  %v1169_v59 = vmax.f32 %v1103_v52, 0.0 }
 0x1e2   : > { %v1105_v55 = vpop.f32.mrf.mxu0  ;;  %2134 = vmatmul.mubr.bf16.gmra.mxu1 %v1190_v50 }
 0x1e3   : > { %v1106_v56 = vadd.f32 %v2569_v0, %v1105_v55  ;;  %v1172_v57 = vmax.f32 %v1114_v53, 0.0 }
 0x1e4   : > { %v2095_v58 = vpop.f32.mrf.mxu0 }
 0x1e5   : > { %v1170_v60 = vmax.f32 %v1106_v56, 0.0  ;;  %v1192_v1 = vpack.c.bf16 %v1172_v57, %v1171_v61  ;;  %v1127_v5 = vadd.f32 %v2095_v58, %v2569_v0 }
 0x1e6   : > { %v1118_v62 = vpop.f32.mrf.mxu0 }
 0x1e7   : > { %v1191_v63 = vpack.c.bf16 %v1170_v60, %v1169_v59  ;;  %v1119_v3 = vadd.f32 %v2569_v0, %v1118_v62  ;;  %v1175_v12 = vmax.f32 %v1127_v5, 0.0 }
 0x1e8   : > { %v2096_v2 = vpop.f32.mrf.mxu0 }
 0x1e9   : > { %v1130_v4 = vadd.f32 %v2096_v2, %v2569_v0  ;;  %2137 = vmatprep.mubr.bf16.mxu1 %v1191_v63  ;;  %v1173_v10 = vmax.f32 %v1119_v3, 0.0 }
 0x1ea   : > { %v1121_v6 = vpop.f32.mrf.mxu0  ;;  %2138 = vmatmul.mubr.bf16.gmra.mxu1 %v1192_v1 }
 0x1eb   : > { %v1122_v7 = vadd.f32 %v2569_v0, %v1121_v6  ;;  %v1176_v8 = vmax.f32 %v1130_v4, 0.0 }
 0x1ec   : > { %v2099_v9 = vpop.f32.mrf.mxu0 }
 0x1ed   : > { %v1174_v11 = vmax.f32 %v1122_v7, 0.0  ;;  %v1194_v15 = vpack.c.bf16 %v1176_v8, %v1175_v12  ;;  %v1143_v19 = vadd.f32 %v2099_v9, %v2569_v0 }
 0x1ee   : > { %v1134_v13 = vpop.f32.mrf.mxu0 }
 0x1ef   : > { %v1193_v14 = vpack.c.bf16 %v1174_v11, %v1173_v10  ;;  %v1135_v17 = vadd.f32 %v2569_v0, %v1134_v13  ;;  %v1179_v25 = vmax.f32 %v1143_v19, 0.0 }
 0x1f0   : > { %v2100_v16 = vpop.f32.mrf.mxu0 }
 0x1f1   : > { %v1146_v18 = vadd.f32 %v2100_v16, %v2569_v0  ;;  %2141 = vmatprep.mubr.bf16.mxu1 %v1193_v14  ;;  %v1177_v23 = vmax.f32 %v1135_v17, 0.0 }
 0x1f2   : > { %v1137_v20 = vpop.f32.mrf.mxu0  ;;  %2142 = vmatmul.mubr.bf16.gmra.mxu1 %v1194_v15 }
 0x1f3   : > { %v1138_v21 = vadd.f32 %v2569_v0, %v1137_v20  ;;  %v1180_v22 = vmax.f32 %v1146_v18, 0.0 }
 0x1f5   : > { %v1178_v24 = vmax.f32 %v1138_v21, 0.0  ;;  %v1196_v27 = vpack.c.bf16 %v1180_v22, %v1179_v25 }
 0x1f7   : > { %v1195_v26 = vpack.c.bf16 %v1178_v24, %v1177_v23 }
 0x1f9   : > { %2145 = vmatprep.mubr.bf16.mxu1 %v1195_v26 }
 0x1fa   : > { %2146 = vmatmul.mubr.bf16.gmra.mxu1 %v1196_v27 }
 0x282   : > { %v2119_v28 = vpop.f32.mrf.mxu1 }
 0x283   : > { %v1294_v0 = vadd.f32 %v2119_v28, %v2607_v29 }
 0x284   : > { %v1285_v30 = vpop.f32.mrf.mxu1 }
 0x285   : > { %v1286_v34 = vadd.f32 %v2607_v29, %v1285_v30 }
 0x286   : > { %v2120_v31 = vpop.f32.mrf.mxu1 }
 0x287   : > { %v1297_v32 = vadd.f32 %v2120_v31, %v2607_v29 }
 0x288   : > { %v1288_v33 = vpop.f32.mrf.mxu1 }
 0x289   : > { %v1804_v35 = vpack.c.bf16 %v1297_v32, %v1294_v0  ;;  %v1289_v36 = vadd.f32 %v2607_v29, %v1288_v33 }
 0x28a   : > { %v2123_v37 = vpop.f32.mrf.mxu1 }
 0x28b   : > { %1876 = vst [vmem:[%s2615_s17 + $0x8] sm:$0xff] %v1804_v35   ;;  %v1799_v38 = vpack.c.bf16 %v1289_v36, %v1286_v34  ;;  %v1310_v41 = vadd.f32 %v2123_v37, %v2607_v29 }
 0x28c   : > { %v1301_v39 = vpop.f32.mrf.mxu1 }
 0x28d   : > { %1800 = vst [vmem:[%s2615_s17] sm:$0xff] %v1799_v38   ;;  %v1302_v44 = vadd.f32 %v2607_v29, %v1301_v39 }
 0x28e   : > { %v2124_v40 = vpop.f32.mrf.mxu1 }
 0x28f   : > { %v1313_v42 = vadd.f32 %v2124_v40, %v2607_v29 }
 0x290   : > { %v1304_v43 = vpop.f32.mrf.mxu1 }
 0x291   : > { %v1814_v45 = vpack.c.bf16 %v1313_v42, %v1310_v41  ;;  %v1305_v46 = vadd.f32 %v2607_v29, %v1304_v43 }
 0x292   : > { %v2127_v47 = vpop.f32.mrf.mxu1 }
 0x293   : > { %1878 = vst [vmem:[%s2615_s17 + $0x18] sm:$0xff] %v1814_v45   ;;  %v1809_v48 = vpack.c.bf16 %v1305_v46, %v1302_v44  ;;  %v1326_v51 = vadd.f32 %v2127_v47, %v2607_v29 }
 0x294   : > { %v1317_v49 = vpop.f32.mrf.mxu1 }
 0x295   : > { %1877 = vst [vmem:[%s2615_s17 + $0x10] sm:$0xff] %v1809_v48   ;;  %v1318_v54 = vadd.f32 %v2607_v29, %v1317_v49 }
 0x296   : > { %v2128_v50 = vpop.f32.mrf.mxu1 }
 0x297   : > { %v1329_v52 = vadd.f32 %v2128_v50, %v2607_v29 }
 0x298   : > { %v1320_v53 = vpop.f32.mrf.mxu1 }
 0x299   : > { %v1824_v55 = vpack.c.bf16 %v1329_v52, %v1326_v51  ;;  %v1321_v56 = vadd.f32 %v2607_v29, %v1320_v53 }
 0x29a   : > { %v2131_v57 = vpop.f32.mrf.mxu1 }
 0x29b   : > { %1880 = vst [vmem:[%s2615_s17 + $0x28] sm:$0xff] %v1824_v55   ;;  %v1819_v58 = vpack.c.bf16 %v1321_v56, %v1318_v54  ;;  %v1342_v61 = vadd.f32 %v2131_v57, %v2607_v29 }
 0x29c   : > { %v1333_v59 = vpop.f32.mrf.mxu1 }
 0x29d   : > { %1879 = vst [vmem:[%s2615_s17 + $0x20] sm:$0xff] %v1819_v58   ;;  %v1334_v1 = vadd.f32 %v2607_v29, %v1333_v59 }
 0x29e   : > { %v2132_v60 = vpop.f32.mrf.mxu1 }
 0x29f   : > { %v1345_v62 = vadd.f32 %v2132_v60, %v2607_v29 }
 0x2a0   : > { %v1336_v63 = vpop.f32.mrf.mxu1 }
 0x2a1   : > { %v1834_v2 = vpack.c.bf16 %v1345_v62, %v1342_v61  ;;  %v1337_v3 = vadd.f32 %v2607_v29, %v1336_v63 }
 0x2a2   : > { %v2135_v4 = vpop.f32.mrf.mxu1 }
 0x2a3   : > { %1882 = vst [vmem:[%s2615_s17 + $0x38] sm:$0xff] %v1834_v2   ;;  %v1829_v5 = vpack.c.bf16 %v1337_v3, %v1334_v1  ;;  %v1358_v8 = vadd.f32 %v2135_v4, %v2607_v29 }
 0x2a4   : > { %v1349_v6 = vpop.f32.mrf.mxu1 }
 0x2a5   : > { %1881 = vst [vmem:[%s2615_s17 + $0x30] sm:$0xff] %v1829_v5   ;;  %v1350_v11 = vadd.f32 %v2607_v29, %v1349_v6 }
 0x2a6   : > { %v2136_v7 = vpop.f32.mrf.mxu1 }
 0x2a7   : > { %v1361_v9 = vadd.f32 %v2136_v7, %v2607_v29 }
 0x2a8   : > { %v1352_v10 = vpop.f32.mrf.mxu1 }
 0x2a9   : > { %v1844_v12 = vpack.c.bf16 %v1361_v9, %v1358_v8  ;;  %v1353_v13 = vadd.f32 %v2607_v29, %v1352_v10 }
 0x2aa   : > { %v2139_v14 = vpop.f32.mrf.mxu1 }
 0x2ab   : > { %1884 = vst [vmem:[%s2615_s17 + $0x48] sm:$0xff] %v1844_v12   ;;  %v1839_v15 = vpack.c.bf16 %v1353_v13, %v1350_v11  ;;  %v1374_v18 = vadd.f32 %v2139_v14, %v2607_v29 }
 0x2ac   : > { %v1365_v16 = vpop.f32.mrf.mxu1 }
 0x2ad   : > { %1883 = vst [vmem:[%s2615_s17 + $0x40] sm:$0xff] %v1839_v15   ;;  %v1366_v21 = vadd.f32 %v2607_v29, %v1365_v16 }
 0x2ae   : > { %v2140_v17 = vpop.f32.mrf.mxu1 }
 0x2af   : > { %v1377_v19 = vadd.f32 %v2140_v17, %v2607_v29 }
 0x2b0   : > { %v1368_v20 = vpop.f32.mrf.mxu1 }
 0x2b1   : > { %v1854_v22 = vpack.c.bf16 %v1377_v19, %v1374_v18  ;;  %v1369_v23 = vadd.f32 %v2607_v29, %v1368_v20 }
 0x2b2   : > { %v2143_v24 = vpop.f32.mrf.mxu1 }
 0x2b3   : > { %1886 = vst [vmem:[%s2615_s17 + $0x58] sm:$0xff] %v1854_v22   ;;  %v1849_v25 = vpack.c.bf16 %v1369_v23, %v1366_v21  ;;  %v1390_v28 = vadd.f32 %v2143_v24, %v2607_v29 }
 0x2b4   : > { %v1381_v26 = vpop.f32.mrf.mxu1 }
 0x2b5   : > { %1885 = vst [vmem:[%s2615_s17 + $0x50] sm:$0xff] %v1849_v25   ;;  %v1382_v0 = vadd.f32 %v2607_v29, %v1381_v26 }
 0x2b6   : > { %v2144_v27 = vpop.f32.mrf.mxu1 }
 0x2b7   : > { %v1393_v30 = vadd.f32 %v2144_v27, %v2607_v29 }
 0x2b8   : > { %v1384_v31 = vpop.f32.mrf.mxu1 }
 0x2b9   : > { %v1864_v32 = vpack.c.bf16 %v1393_v30, %v1390_v28  ;;  %v1385_v33 = vadd.f32 %v2607_v29, %v1384_v31 }
 0x2ba   : > { %v2147_v34 = vpop.f32.mrf.mxu1 }
 0x2bb   : > { %1888 = vst [vmem:[%s2615_s17 + $0x68] sm:$0xff] %v1864_v32   ;;  %v1859_v35 = vpack.c.bf16 %v1385_v33, %v1382_v0  ;;  %v1406_v38 = vadd.f32 %v2147_v34, %v2607_v29 }
 0x2bc   : > { %v1397_v36 = vpop.f32.mrf.mxu1 }
 0x2bd   : > { %1887 = vst [vmem:[%s2615_s17 + $0x60] sm:$0xff] %v1859_v35   ;;  %v1398_v41 = vadd.f32 %v2607_v29, %v1397_v36 }
 0x2be   : > { %v2148_v37 = vpop.f32.mrf.mxu1 }
 0x2bf   : > { %v1409_v39 = vadd.f32 %v2148_v37, %v2607_v29 }
 0x2c0   : > { %v1400_v40 = vpop.f32.mrf.mxu1 }
 0x2c1   : > { %v1874_v42 = vpack.c.bf16 %v1409_v39, %v1406_v38  ;;  %v1401_v43 = vadd.f32 %v2607_v29, %v1400_v40 }
 0x2c3   : > { %1890 = vst [vmem:[%s2615_s17 + $0x78] sm:$0xff] %v1874_v42   ;;  %v1869_v44 = vpack.c.bf16 %v1401_v43, %v1398_v41 }
 0x2c5   : > { %1889 = vst [vmem:[%s2615_s17 + $0x70] sm:$0xff] %v1869_v44  }
 0x2c6   : > { %2226 = shalt.err (!%p2223_p3)
}
 0x2c7   : > { %s2227_s10 = scalar_lea.hbm %s2664_s6, 2048  ;;  %s2231_s14 = scalar_lea.hbm %s2717_s5, 4096 }
 0x2c8   : > { %p2228_p4 = scmp.ne.s32.totalorder %s2664_s6, %s2227_s10  ;;  %p2232_p9 = scmp.lt.s32.totalorder %s2664_s6, %s2717_s5 }
 0x2c9   : > { %p2233_p10 = scmp.lt.s32.totalorder %s2231_s14, %s2227_s10 }
 0x2ca   : > { %p2229_p7 = pnand %p2228_p4, %p2346_p5 }
 0x2cb   : > { %p2234_p11 = por %p2233_p10, %p2232_p9 }
 0x2cc   : > { %p2230_p8 = pneg %p2229_p7 }
 0x2ce   : > { %p2235_p12 = pnand %p2234_p11, %p2230_p8 }
 0x2d0   : > { %2238 = shalt.err (!%p2235_p12)
}
 0x2d1   : > { %s2276_s17 = smov 64   ;;  %s2277_s23 = smov 4  }
 0x2d2   : > { %2150 = dma.vmem_to_hbm [thread:$0]  (%p2346_p5), %s2666_s25, 2048, %s2664_s6, %s2672_s22, %s2276_s17, %s2276_s17, %s2277_s23  }
 0x2d3 PF: > { %p2156_p13 = scmp.ge.s32.totalorder %s2273_s21, 2  ;;  %s1601_s26 = sand.u32 1, %s2261_s18  }
 0x2d4   : > { %s1602_s30 = scalar_lea.sflag [#allocation3], %s1601_s26 }
 0x2d5   : > { %p2153_p0 = pnand %p2156_p13, %p2350_p6 }
 0x2d7   : > { %p2154_p1 = pneg %p2153_p0 }
 0x2d9   : > { %2256 = dma.done.wait (%p2154_p1), %s1602_s30, 2048  }
 0x2da   : > { %2258 = vsyncadd (%p2154_p1), %s1602_s30, 4294965248  ;;  %p15_p2 = scmp.ge.s32.totalorder %s2333_s24, 4   ;;  %s2720_s18 = smov %s2265_s19 }
 0x2db   : > { %s2721_s19 = smov %s2269_s20  ;;  %s2722_s20 = smov %s2344_s27 }
 0x2dc   : > { %s2723_s21 = smov %s2333_s24  ;;  %17 = sbr.rel (!%p15_p2) target bundleno = 3 (0x3), region = 78 }
 0x2e1   :  { %1607 = vsyncpa [#allocation3], 1 }
 0x2e2   :  { %1609 = vsyncpa [#allocation3 + $0x1], 1 }

</bundles_post_ra>
